<compile_context>
chip_gen: v6e
topology: v6e:2x2x1
jax: 0.10.0
libtpu: 0.0.40
codegen_flags: <defaults>
</compile_context>

<pallas_src>
import functools

import numpy as np
import jax
import jax.numpy as jnp
from jax import lax
from jax.experimental import pallas as pl
from jax.experimental.pallas import tpu as pltpu

_MASK_VAL = -1e30   # additive mask value for non-edges
_M_INIT = -1e20     # running-max init; gap to _MASK_VAL guarantees exp()==0
                    # for masked entries even before a row sees its first edge.


def _round_up(x, m):
    return ((x + m - 1) // m) * m


def _use_bf16_exp():
    """bf16 exp on v6e / v7x (bf16-capable EUP); f32 on v5e and older."""
    try:
        kind = jax.devices()[0].device_kind.lower()
    except Exception:
        return False
    for tag in ("v2", "v3", "v4", "v5"):
        if tag in kind:
            return False
    return True


# -----------------------------------------------------------------------------
# Stage 1: fused projection -> xl_aug (bf16), residual+bias, per-head scores
# -----------------------------------------------------------------------------
def proj_kernel(x_ref, wlin_ref, wres_ref, watt_ref, ones_row_ref, bias_row_ref,
                xlaug_ref, resb_ref, sij_ref):
    x = x_ref[...]
    # x @ W_lin with a zero column per head, + ones_row -> [xl_h | 1] per head.
    xlaug_ref[...] = (jnp.dot(x, wlin_ref[...], preferred_element_type=jnp.float32)
                      + ones_row_ref[...]).astype(jnp.bfloat16)
    # residual projection with both biases folded in.
    resb_ref[...] = (jnp.dot(x, wres_ref[...], preferred_element_type=jnp.float32)
                     + bias_row_ref[...])
    # per-head attention scores: [si | sj]  (att vectors folded into weights).
    sij_ref[...] = jnp.dot(x, watt_ref[...], preferred_element_type=jnp.float32)


# -----------------------------------------------------------------------------
# Stage 2: tiled GAT aggregation with online masked softmax
# -----------------------------------------------------------------------------
def gat_attn_kernel(flags_ref, jprev_ref,                         # scalar prefetch (SMEM, 1-D)
                    si_ref, sjt_ref, xl_ref, mask_ref, resb_ref,  # inputs
                    out_ref,                                      # output
                    m_sc, l_sc, acc_sc,                           # VMEM scratch
                    *, heads, out_dim, n_j, bf16_exp):
    del jprev_ref  # consumed only by the index_maps (DMA elision for empty blocks)
    i = pl.program_id(0)
    j = pl.program_id(1)
    da = out_dim + 1

    @pl.when(j == 0)
    def _init():
        m_sc[...] = jnp.full_like(m_sc, _M_INIT)
        l_sc[...] = jnp.zeros_like(l_sc)
        acc_sc[...] = jnp.zeros_like(acc_sc)

    # Skip compute for tiles whose adjacency block is all-zero (block sparsity).
    @pl.when(flags_ref[i * n_j + j] != 0)
    def _update():
        mask = mask_ref[...].astype(jnp.float32)   # [tq, tk] additive mask (0 / -1e30)
        xlj = xl_ref[...]                          # [tk, H*(D+1)] bf16 (MXU rhs)
        m_prev = m_sc[...]                         # [tq, H]  (read scratch once)
        l_prev = l_sc[...]                         # [tq, H]
        acc_prev = acc_sc[...]                     # [tq, H*D]

        m_cols, l_cols, acc_cols = [], [], []
        for h in range(heads):                     # heads: small static constant
            # alpha[i, j] = si[i] + sj[j]; leaky_relu(0.2); additive mask.
            e = si_ref[:, h:h + 1] + sjt_ref[h:h + 1, :]         # [tq, tk]
            e = jnp.maximum(e, 0.2 * e)                          # leaky relu
            e = e + mask                                         # mask non-edges
            mp = m_prev[:, h:h + 1]
            mn = jnp.maximum(mp, jnp.max(e, axis=1, keepdims=True))
            scale = jnp.exp(mp - mn)                             # [tq, 1] f32
            if bf16_exp:
                p = jnp.exp((e - mn).astype(jnp.bfloat16))       # bf16 EUP (v6e/v7x)
            else:
                p = jnp.exp(e - mn).astype(jnp.bfloat16)         # f32 EUP (v5e etc.)
            # One MXU dot yields both P @ xl_h (cols :D) and sum_k p (col D).
            pv = jnp.dot(p, xlj[:, h * da:(h + 1) * da],
                         preferred_element_type=jnp.float32)     # [tq, D+1]
            m_cols.append(mn)
            l_cols.append(scale * l_prev[:, h:h + 1] + pv[:, out_dim:])
            acc_cols.append(scale * acc_prev[:, h * out_dim:(h + 1) * out_dim]
                            + pv[:, :out_dim])

        # Single full-width scratch store per tile (no masked column stores).
        m_sc[...] = jnp.concatenate(m_cols, axis=-1)
        l_sc[...] = jnp.concatenate(l_cols, axis=-1)
        acc_sc[...] = jnp.concatenate(acc_cols, axis=-1)

    @pl.when(j == pl.num_programs(1) - 1)
    def _finalize():
        # Once per destination row tile: exact reciprocal is essentially free here.
        inv = pl.reciprocal(l_sc[...] + 1e-16)                   # [tq, H]
        acc = acc_sc[...]
        cols = [acc[:, h * out_dim:(h + 1) * out_dim] * inv[:, h:h + 1]
                for h in range(heads)]
        out_ref[...] = jnp.concatenate(cols, axis=-1) + resb_ref[...]


# -----------------------------------------------------------------------------
# Adjacency preprocessing (plain-JAX glue).
# For a static graph this should be hoisted out of the per-call path: it reads
# the full N^2 adjacency, which can rival the kernel's own adjacency traffic.
# -----------------------------------------------------------------------------
def _prep_adjacency(adj, n, n_pad, tq, tk):
    n_i, n_j = n_pad // tq, n_pad // tk
    adj_p = jnp.zeros((n_pad, n_pad), jnp.bool_).at[:n, :n].set(adj)
    mask_bf = jnp.where(adj_p, 0.0, _MASK_VAL).astype(jnp.bfloat16)
    flags2d = jnp.any(adj_p.reshape(n_i, tq, n_j, tk), axis=(1, 3))
    col = jnp.arange(n_j, dtype=jnp.int32)
    # jprev[i, j] = nearest non-empty block index at-or-before j (else the next
    # non-empty one, else 0).  Empty blocks map to an already / soon resident
    # block index, so Pallas elides their DMAs entirely.
    last_le = lax.cummax(jnp.where(flags2d, col[None, :], -1), axis=1)
    first_ge = lax.cummin(jnp.where(flags2d, col[None, :], n_j), axis=1, reverse=True)
    jprev2d = jnp.where(last_le >= 0, last_le,
                        jnp.where(first_ge < n_j, first_ge, 0)).astype(jnp.int32)
    # 1-D flags/jprev: avoids 2-D SMEM padding to [ceil(n_i/8)*8, ceil(n_j/128)*128].
    return mask_bf, flags2d.astype(jnp.int32).reshape(-1), jprev2d.reshape(-1)


# -----------------------------------------------------------------------------
# Wrapper
# -----------------------------------------------------------------------------
def gat_forward(x, adj, w_lin, w_res, att_i, att_j, bias, b_res,
                *, heads, out_dim, tq=256, tk=1024, bf16_exp=None):
    """GATLayer forward (heads=H, concat=True, residual=True, norm='None', eval).

    x      : [N, in_dim] f32 node features
    adj    : [N, N] bool, adj[r, c] = True iff edge (dst=r, src=c) after
             remove_self_loops + add_self_loops
    w_lin  : [in_dim, H*D]  (lin.weight.T, no bias)
    w_res  : [in_dim, H*D]  (lin_residual.weight.T)
    att_i, att_j : [H, D]
    bias, b_res  : [H*D]

    Tile defaults (tq=256 x tk=1024, bf16 mask) keep the double-buffered
    per-step working set at a few MiB, inside the scoped-VMEM default on
    v5e/v6e/v7x; no vmem_limit override needed.  Larger tk amortizes the
    ~0.35 us/grid-step overhead but coarsens block-skip granularity, so
    co-tune with the graph's block sparsity.
    """
    n, in_dim = x.shape
    hd = heads * out_dim
    da = out_dim + 1

    if bf16_exp is None:
        bf16_exp = _use_bf16_exp()

    # --- tiling: row tile tq (mult of 8), col tile tk (mult of 128) ---
    tk = min(tk, _round_up(n, 128))
    n_pad = _round_up(n, tk)
    tq = min(tq, n_pad)
    if n_pad % tq:
        tq = 128                    # n_pad is always a multiple of 128
    # Keep >= 2 destination-row tiles so the "parallel" i axis can shard across
    # both TensorCores on v7x (a single row tile would idle one core).
    if n_pad // tq < 2 and n_pad >= 256:
        tq = n_pad // 2
    assert tq % 8 == 0 and tk % 128 == 0 and n_pad % tq == 0 and n_pad % tk == 0
    n_i, n_j = n_pad // tq, n_pad // tk

    x_p = jnp.zeros((n_pad, in_dim), jnp.float32).at[:n].set(x)

    # --- stage-1 weights ---
    w3 = w_lin.reshape(in_dim, heads, out_dim)
    # W_lin with a zero column appended per head; the ones_row fills it with 1.0
    # so each head's rhs block in stage 2 is [xl_h | 1].
    w_aug = jnp.concatenate(
        [w3, jnp.zeros((in_dim, heads, 1), w_lin.dtype)], axis=-1
    ).reshape(in_dim, heads * da).astype(jnp.float32)
    ones_row = jnp.tile(
        jnp.concatenate([jnp.zeros((out_dim,), jnp.float32),
                         jnp.ones((1,), jnp.float32)]), heads).reshape(1, heads * da)
    a_i = (w3 * att_i[None, :, :]).sum(-1)                      # [in_dim, H]
    a_j = (w3 * att_j[None, :, :]).sum(-1)                      # [in_dim, H]
    w_att = jnp.concatenate([a_i, a_j], axis=1).astype(jnp.float32)   # [in_dim, 2H]
    bias_row = (bias + b_res).reshape(1, hd).astype(jnp.float32)
    w_res_f = w_res.astype(jnp.float32)

    # --- stage 1: fused projection, separate lane-dense outputs ---
    xlaug, resb, sij = pl.pallas_call(
        proj_kernel,
        grid=(n_i,),
        in_specs=[pl.BlockSpec((tq, in_dim), lambda i: (i, 0)),
                  pl.BlockSpec((in_dim, heads * da), lambda i: (0, 0)),
                  pl.BlockSpec((in_dim, hd), lambda i: (0, 0)),
                  pl.BlockSpec((in_dim, 2 * heads), lambda i: (0, 0)),
                  pl.BlockSpec((1, heads * da), lambda i: (0, 0)),
                  pl.BlockSpec((1, hd), lambda i: (0, 0))],
        out_specs=[pl.BlockSpec((tq, heads * da), lambda i: (i, 0)),
                   pl.BlockSpec((tq, hd), lambda i: (i, 0)),
                   pl.BlockSpec((tq, 2 * heads), lambda i: (i, 0))],
        out_shape=(jax.ShapeDtypeStruct((n_pad, heads * da), jnp.bfloat16),
                   jax.ShapeDtypeStruct((n_pad, hd), jnp.float32),
                   jax.ShapeDtypeStruct((n_pad, 2 * heads), jnp.float32)),
        compiler_params=pltpu.CompilerParams(dimension_semantics=("parallel",)),
    )(x_p, w_aug, w_res_f, w_att, ones_row, bias_row)

    si = sij[:, :heads]                 # [n_pad, H]   (x_i . att_i)
    sjt = sij[:, heads:].T              # [H, n_pad]   (x_j . att_j), tiny transpose

    mask_bf, flags, jprev = _prep_adjacency(adj, n, n_pad, tq, tk)

    # --- stage 2: tiled aggregation with online masked softmax ---
    kernel = functools.partial(gat_attn_kernel, heads=heads, out_dim=out_dim,
                               n_j=n_j, bf16_exp=bf16_exp)
    out_p = pl.pallas_call(
        kernel,
        out_shape=jax.ShapeDtypeStruct((n_pad, hd), jnp.float32),
        grid_spec=pltpu.PrefetchScalarGridSpec(
            num_scalar_prefetch=2,
            grid=(n_i, n_j),
            in_specs=[
                # si: per destination-row tile.
                pl.BlockSpec((tq, heads), lambda i, j, f, jp: (i, 0)),
                # sj (lane-major per source tile); empty blocks reuse jprev -> DMA elided.
                pl.BlockSpec((heads, tk),
                             lambda i, j, f, jp: (0, jp[i * n_j + j])),
                # source features [xl_h | 1] per head, bf16.
                pl.BlockSpec((tk, heads * da),
                             lambda i, j, f, jp: (jp[i * n_j + j], 0)),
                # additive bf16 adjacency mask.
                pl.BlockSpec((tq, tk),
                             lambda i, j, f, jp: (i, jp[i * n_j + j])),
                # residual + biases, per destination-row tile.
                pl.BlockSpec((tq, hd), lambda i, j, f, jp: (i, 0)),
            ],
            out_specs=pl.BlockSpec((tq, hd), lambda i, j, f, jp: (i, 0)),
            scratch_shapes=[
                pltpu.VMEM((tq, heads), jnp.float32),   # running max  m
                pltpu.VMEM((tq, heads), jnp.float32),   # running sum  l
                pltpu.VMEM((tq, hd), jnp.float32),      # running weighted sum
            ],
        ),
        compiler_params=pltpu.CompilerParams(
            dimension_semantics=("parallel", "arbitrary")),
    )(flags, jprev, si, sjt, xlaug, mask_bf, resb)

    return out_p[:n]


# -----------------------------------------------------------------------------
# Pure-numpy (float64) reference with identical math, for the correctness check
# -----------------------------------------------------------------------------
def reference_forward_np(x, adj, w_lin, w_res, att_i, att_j, bias, b_res,
                         *, heads, out_dim):
    x = np.asarray(x, np.float64)
    adj = np.asarray(adj)
    w_lin = np.asarray(w_lin, np.float64)
    w_res = np.asarray(w_res, np.float64)
    att_i = np.asarray(att_i, np.float64)
    att_j = np.asarray(att_j, np.float64)
    bias = np.asarray(bias, np.float64)
    b_res = np.asarray(b_res, np.float64)

    xl = x @ w_lin
    outs = []
    for h in range(heads):
        xlh = xl[:, h * out_dim:(h + 1) * out_dim]
        si = xlh @ att_i[h]
        sj = xlh @ att_j[h]
        e = si[:, None] + sj[None, :]
        e = np.where(e > 0, e, 0.2 * e)
        e = np.where(adj, e, -np.inf)
        m = e.max(axis=1, keepdims=True)
        p = np.where(adj, np.exp(e - m), 0.0)
        alpha = p / (p.sum(1, keepdims=True) + 1e-16)
        outs.append(alpha @ xlh)
    out = np.concatenate(outs, -1)
    return out + bias[None, :] + x @ w_res + b_res[None, :]


def glorot(key, shape):
    fan_in, fan_out = shape[-2], shape[-1]
    bound = float(np.sqrt(6.0 / (fan_in + fan_out)))
    return jax.random.uniform(key, shape, jnp.float32, -bound, bound)


if __name__ == "__main__":
    # Small shapes consistent with the module (a GNN layer over ~200 nodes).
    N, IN_DIM, HEADS, OUT_DIM = 200, 8, 4, 8
    HD = HEADS * OUT_DIM

    key = jax.random.PRNGKey(0)
    k_x, k_e1, k_e2, k_wl, k_wr, k_ai, k_aj, k_b1, k_b2 = jax.random.split(key, 9)

    x = jax.random.normal(k_x, (N, IN_DIM), jnp.float32)

    # Random edge_index [2, E]; columns restricted to [0, 100) so that some
    # (row-tile, col-tile) adjacency blocks are empty and both the compute-skip
    # and DMA-elision paths are exercised.
    E = 600
    row_idx = jax.random.randint(k_e1, (E,), 0, N)
    col_idx = jax.random.randint(k_e2, (E,), 0, 100)

    # remove_self_loops + add_self_loops  ->  dense boolean adjacency.
    nonself = (row_idx != col_idx).astype(jnp.int32)
    adj_cnt = jnp.zeros((N, N), jnp.int32).at[row_idx, col_idx].max(nonself)
    adj = (adj_cnt > 0) | jnp.eye(N, dtype=jnp.bool_)

    # Parameters (lin has no bias; lin_residual has bias; self.bias added to out).
    w_lin = glorot(k_wl, (IN_DIM, HD))        # lin.weight.T
    w_res = glorot(k_wr, (IN_DIM, HD))        # lin_residual.weight.T (concat=True)
    att_i = glorot(k_ai, (HEADS, OUT_DIM))    # att_i[1, H, D] squeezed
    att_j = glorot(k_aj, (HEADS, OUT_DIM))    # att_j[1, H, D] squeezed
    bias = 0.1 * jax.random.normal(k_b1, (HD,), jnp.float32)
    b_res = 0.1 * jax.random.normal(k_b2, (HD,), jnp.float32)

    # Small tiles here so the test exercises a multi-block grid (4 x 2),
    # multi-step online softmax, the empty-block compute-skip and DMA-elision;
    # production defaults are tq=256, tk=1024.
    out = gat_forward(x, adj, w_lin, w_res, att_i, att_j, bias, b_res,
                      heads=HEADS, out_dim=OUT_DIM, tq=64, tk=128)
    out = jax.block_until_ready(out)

    ref = reference_forward_np(x, adj, w_lin, w_res, att_i, att_j, bias, b_res,
                               heads=HEADS, out_dim=OUT_DIM)
    assert out.shape == (N, HD)
    out_np = np.asarray(out, np.float64)
    # bf16 is used at the mask / exp-argument / MXU boundaries by design ->
    # ~1e-3-level abs error vs the f64 reference.
    err = float(np.abs(out_np - ref).max())
    assert np.allclose(out_np, ref, atol=3e-2, rtol=3e-2), err

    print("KERNEL_OK")
</pallas_src>

<mosaic_0001>
module attributes {stable_mosaic.version = 11 : i64} {
  func.func @proj_kernel(%arg0: i32, %arg1: memref<64x8xf32, #tpu.memory_space<vmem>>, %arg2: memref<8x36xf32, #tpu.memory_space<vmem>>, %arg3: memref<8x32xf32, #tpu.memory_space<vmem>>, %arg4: memref<8x8xf32, #tpu.memory_space<vmem>>, %arg5: memref<1x36xf32, #tpu.memory_space<vmem>>, %arg6: memref<1x32xf32, #tpu.memory_space<vmem>>, %arg7: memref<64x36xbf16, #tpu.memory_space<vmem>>, %arg8: memref<64x32xf32, #tpu.memory_space<vmem>>, %arg9: memref<64x8xf32, #tpu.memory_space<vmem>>) attributes {dimension_semantics = [#tpu.dimension_semantics<parallel>], iteration_bounds = array<i64: 4>, scalar_prefetch = 0 : i64, scratch_operands = 0 : i64, tpu.core_type = #tpu.core_type<tc>, window_params = [{transform_indices = @transform_0, window_bounds = array<i64: 64, 8>}, {pipeline_mode = #tpu.pipeline_mode<synchronous>, transform_indices = @transform_1, window_bounds = array<i64: 8, 36>}, {pipeline_mode = #tpu.pipeline_mode<synchronous>, transform_indices = @transform_2, window_bounds = array<i64: 8, 32>}, {pipeline_mode = #tpu.pipeline_mode<synchronous>, transform_indices = @transform_3, window_bounds = array<i64: 8, 8>}, {pipeline_mode = #tpu.pipeline_mode<synchronous>, transform_indices = @transform_4, window_bounds = array<i64: 1, 36>}, {pipeline_mode = #tpu.pipeline_mode<synchronous>, transform_indices = @transform_5, window_bounds = array<i64: 1, 32>}, {transform_indices = @transform_6, window_bounds = array<i64: 64, 36>}, {transform_indices = @transform_7, window_bounds = array<i64: 64, 32>}, {transform_indices = @transform_8, window_bounds = array<i64: 64, 8>}]} {
    %c0 = arith.constant 0 : index
    %c0_0 = arith.constant 0 : index
    %0 = vector.load %arg1[%c0, %c0_0] : memref<64x8xf32, #tpu.memory_space<vmem>>, vector<64x8xf32>
    %c0_1 = arith.constant 0 : index
    %c0_2 = arith.constant 0 : index
    %1 = vector.load %arg2[%c0_1, %c0_2] : memref<8x36xf32, #tpu.memory_space<vmem>>, vector<8x36xf32>
    %cst = arith.constant dense<0.000000e+00> : vector<64x36xf32>
    %2 = tpu.matmul %0, %1, %cst {dimension_numbers = #tpu.dot_dimension_numbers<[1], [0], [0], [1], [0, 0, 1, 1], [], []>} : vector<64x8xf32>, vector<8x36xf32>, vector<64x36xf32> -> vector<64x36xf32>
    %c0_3 = arith.constant 0 : index
    %c0_4 = arith.constant 0 : index
    %3 = vector.load %arg5[%c0_3, %c0_4] : memref<1x36xf32, #tpu.memory_space<vmem>>, vector<1x36xf32>
    %4 = vector.broadcast %3 : vector<1x36xf32> to vector<64x36xf32>
    %5 = arith.addf %2, %4 : vector<64x36xf32>
    %6 = arith.truncf %5 : vector<64x36xf32> to vector<64x36xbf16>
    %c0_5 = arith.constant 0 : index
    %c0_6 = arith.constant 0 : index
    %7 = vector.load %arg7[%c0_5, %c0_6] : memref<64x36xbf16, #tpu.memory_space<vmem>>, vector<64x36xbf16>
    tpu.vector_store %arg7[%c0_5, %c0_6], %6 {strides = array<i32>} : memref<64x36xbf16, #tpu.memory_space<vmem>>, vector<64x36xbf16>,
    %c0_7 = arith.constant 0 : index
    %c0_8 = arith.constant 0 : index
    %8 = vector.load %arg3[%c0_7, %c0_8] : memref<8x32xf32, #tpu.memory_space<vmem>>, vector<8x32xf32>
    %cst_9 = arith.constant dense<0.000000e+00> : vector<64x32xf32>
    %9 = tpu.matmul %0, %8, %cst_9 {dimension_numbers = #tpu.dot_dimension_numbers<[1], [0], [0], [1], [0, 0, 1, 1], [], []>} : vector<64x8xf32>, vector<8x32xf32>, vector<64x32xf32> -> vector<64x32xf32>
    %c0_10 = arith.constant 0 : index
    %c0_11 = arith.constant 0 : index
    %10 = vector.load %arg6[%c0_10, %c0_11] : memref<1x32xf32, #tpu.memory_space<vmem>>, vector<1x32xf32>
    %11 = vector.broadcast %10 : vector<1x32xf32> to vector<64x32xf32>
    %12 = arith.addf %9, %11 : vector<64x32xf32>
    %c0_12 = arith.constant 0 : index
    %c0_13 = arith.constant 0 : index
    %13 = vector.load %arg8[%c0_12, %c0_13] : memref<64x32xf32, #tpu.memory_space<vmem>>, vector<64x32xf32>
    tpu.vector_store %arg8[%c0_12, %c0_13], %12 {strides = array<i32>} : memref<64x32xf32, #tpu.memory_space<vmem>>, vector<64x32xf32>,
    %c0_14 = arith.constant 0 : index
    %c0_15 = arith.constant 0 : index
    %14 = vector.load %arg4[%c0_14, %c0_15] : memref<8x8xf32, #tpu.memory_space<vmem>>, vector<8x8xf32>
    %cst_16 = arith.constant dense<0.000000e+00> : vector<64x8xf32>
    %15 = tpu.matmul %0, %14, %cst_16 {dimension_numbers = #tpu.dot_dimension_numbers<[1], [0], [0], [1], [0, 0, 1, 1], [], []>} : vector<64x8xf32>, vector<8x8xf32>, vector<64x8xf32> -> vector<64x8xf32>
    %c0_17 = arith.constant 0 : index
    %c0_18 = arith.constant 0 : index
    %16 = vector.load %arg9[%c0_17, %c0_18] : memref<64x8xf32, #tpu.memory_space<vmem>>, vector<64x8xf32>
    tpu.vector_store %arg9[%c0_17, %c0_18], %15 {strides = array<i32>} : memref<64x8xf32, #tpu.memory_space<vmem>>, vector<64x8xf32>,
    return
  }
  func.func @transform_0(%arg0: i32) -> (i32, i32) {
    %c0_i32 = arith.constant 0 : i32
    %c0_i32_0 = arith.constant 0 : i32
    return %arg0, %c0_i32 : i32, i32
  }
  func.func @transform_1(%arg0: i32) -> (i32, i32) {
    %c0_i32 = arith.constant 0 : i32
    %c0_i32_0 = arith.constant 0 : i32
    %c0_i32_1 = arith.constant 0 : i32
    return %c0_i32, %c0_i32_0 : i32, i32
  }
  func.func @transform_2(%arg0: i32) -> (i32, i32) {
    %c0_i32 = arith.constant 0 : i32
    %c0_i32_0 = arith.constant 0 : i32
    %c0_i32_1 = arith.constant 0 : i32
    return %c0_i32, %c0_i32_0 : i32, i32
  }
  func.func @transform_3(%arg0: i32) -> (i32, i32) {
    %c0_i32 = arith.constant 0 : i32
    %c0_i32_0 = arith.constant 0 : i32
    %c0_i32_1 = arith.constant 0 : i32
    return %c0_i32, %c0_i32_0 : i32, i32
  }
  func.func @transform_4(%arg0: i32) -> (i32, i32) {
    %c0_i32 = arith.constant 0 : i32
    %c0_i32_0 = arith.constant 0 : i32
    %c0_i32_1 = arith.constant 0 : i32
    return %c0_i32, %c0_i32_0 : i32, i32
  }
  func.func @transform_5(%arg0: i32) -> (i32, i32) {
    %c0_i32 = arith.constant 0 : i32
    %c0_i32_0 = arith.constant 0 : i32
    %c0_i32_1 = arith.constant 0 : i32
    return %c0_i32, %c0_i32_0 : i32, i32
  }
  func.func @transform_6(%arg0: i32) -> (i32, i32) {
    %c0_i32 = arith.constant 0 : i32
    %c0_i32_0 = arith.constant 0 : i32
    return %arg0, %c0_i32 : i32, i32
  }
  func.func @transform_7(%arg0: i32) -> (i32, i32) {
    %c0_i32 = arith.constant 0 : i32
    %c0_i32_0 = arith.constant 0 : i32
    return %arg0, %c0_i32 : i32, i32
  }
  func.func @transform_8(%arg0: i32) -> (i32, i32) {
    %c0_i32 = arith.constant 0 : i32
    %c0_i32_0 = arith.constant 0 : i32
    return %arg0, %c0_i32 : i32, i32
  }
}

</mosaic_0001>

<bundles_post_ra>
// kernel: tpu_custom_call.1
= control target key start
LH: loop header
LB: loop body
LE: loop exit
PB: predicated region body
PF: predicated region fallthrough
CT: control target
= control target key end

     0   :  { %s1072_s27 = smov 0   ;;  %s1197_s0 = inlined_call_operand.vmem [shape: f32[256,8], index: 0, kind: input, shape index: {}]   ;;  %s1198_s1 = inlined_call_operand.vmem [shape: f32[8,36], index: 1, kind: input, shape index: {}]   ;;  %s1199_s2 = inlined_call_operand.vmem [shape: f32[8,32], index: 2, kind: input, shape index: {}]   ;;  %s1200_s3 = inlined_call_operand.vmem [shape: f32[8,8], index: 3, kind: input, shape index: {}]   ;;  %s1201_s4 = inlined_call_operand.vmem [shape: f32[1,36], index: 4, kind: input, shape index: {}]   ;;  %s1202_s5 = inlined_call_operand.vmem [shape: f32[1,32], index: 5, kind: input, shape index: {}]   ;;  %s1203_s6 = inlined_call_operand.vmem [shape: bf16[256,36], index: 6, kind: output, shape index: {0}]   ;;  %s1204_s7 = inlined_call_operand.vmem [shape: f32[256,32], index: 7, kind: output, shape index: {1}]   ;;  %s1205_s8 = inlined_call_operand.vmem [shape: f32[256,8], index: 8, kind: output, shape index: {2}]  }
   0x1 LB: > { %s883_s28 = sadd.s32 4294967295, %s1025_s27   ;;  %p887_p0 = scmp.ge.s32.totalorder %s1025_s27, 1  ;;  %s1025_s27 = sphi %s1072_s27, %s19_s27  }
   0x2   : > { %p268_p1 = scmp.lt.s32.totalorder %s1025_s27, 5 }
   0x4   : > { %p269_p2 = pnand %p887_p0, %p268_p1 }
   0x5   : > { %s888_s9 = sshll.u32 (!%p269_p2), %s883_s28, 3 }
   0x6   : > { %272 = sbr.rel (%p269_p2) target bundleno = 235 (0xeb), region = 44  ;;  %p313_p3 = scmp.lt.s32.totalorder (!%p269_p2), %s888_s9, 31 }
   0xb   : > { %v344_v0 = vld [vmem:[%s1198_s1] sm:$0xff]  ;;  %s1207_s9 = smov (!%p313_p3, %s888_s9), 31  ;;  %vm352_vm0 = vcmask 64512   ;;  %vm514_vm1 = vcmask 289792   ;;  %vm636_vm2 = vcmask 261120  }
   0xc   : > { %v523_v1 = vld [vmem:[%s1199_s2] sm:$0xff]  ;;  %1009 = vmatprep.subr.mxu1 %v344_v0  ;;  %967 = vmatprep.subr.mxu0 %v344_v0  ;;  %s1092_s14 = sshll.u32 %s1207_s9, 3  ;;  %s891_s20 = sshll.u32 %s1207_s9, 2 }
   0xd   : > { %v645_v2 = vld [vmem:[%s1200_s3] sm:$0xff]  ;;  %1010 = vmatpush3.msra.mxu1 %v344_v0  ;;  %968 = vmatpush3.msra.mxu0 %v344_v0  ;;  %s316_s17 = scalar_lea.vmem %s1197_s0, %s1092_s14  ;;  %s1129_s23 = scalar_lea.vmem %s1203_s6, %s891_s20 }
   0xe   : > { %981 = vmatprep.subr.mxu1 %v523_v1  ;;  %995 = vmatprep.subr.mxu0 %v645_v2  ;;  %v336_v3 = vld [vmem:[%s316_s17] sm:$0xff]  ;;  %v337_v5 = vld [vmem:[%s316_s17 + $0x8] sm:$0xff]  ;;  %v338_v7 = vld [vmem:[%s316_s17 + $0x10] sm:$0xff]  ;;  %s1142_s29 = scalar_lea.vmem %s1205_s8, %s1092_s14  ;;  %s1152_s10 = scalar_lea.vmem %s1204_s7, %s1092_s14 }
   0xf   : > { %v340_v4 = vld [vmem:[%s316_s17 + $0x20] sm:$0xff]  ;;  %969 = vmatprep.mubr.msk.f32.mxu0 %vm352_vm0, %v336_v3  ;;  %v341_v6 = vld [vmem:[%s316_s17 + $0x28] sm:$0xff]  ;;  %v342_v8 = vld [vmem:[%s316_s17 + $0x30] sm:$0xff] }
  0x10   : > { %975 = vmatprep.mubr.msk.f32.mxu1 %vm352_vm0, %v340_v4  ;;  %970 = vmatmul.mubr.msk.f32.vlgmr.msra.gmra.mxu0 %vm352_vm0, %v337_v5  ;;  %v339_v9 = vld [vmem:[%s316_s17 + $0x18] sm:$0xff]  ;;  %v896_v11 = vld [vmem:[%s1201_s4] ss:$0 sm:$0xff] }
  0x11   : > { %976 = vmatmul.mubr.msk.f32.vlgmr.msra.gmra.mxu1 %vm352_vm0, %v341_v6  ;;  %996 = vmatpush3.msra.mxu0 %v645_v2  ;;  %v343_v10 = vld [vmem:[%s316_s17 + $0x38] sm:$0xff]  ;;  %v913_v30 = vld [vmem:[%s1202_s5] ss:$0 sm:$0xff] }
  0x12   : > { %982 = vmatpush3.msra.mxu1 %v523_v1  ;;  %972 = vmatprep.mubr.msk.f32.mxu0 %vm352_vm0, %v338_v7 }
  0x13   : > { %978 = vmatprep.mubr.msk.f32.mxu1 %vm352_vm0, %v342_v8 }
  0x14   : > { %973 = vmatmul.mubr.msk.f32.gmra.mxu0 %vm352_vm0, %v339_v9 }
  0x15   : > { %979 = vmatmul.mubr.msk.f32.gmra.mxu1 %vm352_vm0, %v343_v10  ;;  %997 = vmatprep.mubr.msk.f32.mxu0 %vm352_vm0, %v336_v3 }
  0x16   : > { %983 = vmatprep.mubr.msk.f32.mxu1 %vm352_vm0, %v336_v3 }
  0x18   : > { %998 = vmatmul.mubr.msk.f32.vlgmr.msra.gmra.mxu0 %vm352_vm0, %v337_v5 }
  0x19   : > { %984 = vmatmul.mubr.msk.f32.vlgmr.msra.gmra.mxu1 %vm352_vm0, %v337_v5  ;;  %1000 = vmatprep.mubr.msk.f32.mxu0 %vm352_vm0, %v338_v7 }
  0x1a   : > { %986 = vmatprep.mubr.msk.f32.mxu1 %vm352_vm0, %v338_v7 }
  0x1c   : > { %1001 = vmatmul.mubr.msk.f32.gmra.mxu0 %vm352_vm0, %v339_v9 }
  0x1d   : > { %987 = vmatmul.mubr.msk.f32.gmra.mxu1 %vm352_vm0, %v339_v9  ;;  %1003 = vmatprep.mubr.msk.f32.mxu0 %vm352_vm0, %v340_v4 }
  0x1e   : > { %989 = vmatprep.mubr.msk.f32.mxu1 %vm352_vm0, %v340_v4 }
  0x20   : > { %1004 = vmatmul.mubr.msk.f32.gmra.mxu0 %vm352_vm0, %v341_v6 }
  0x21   : > { %990 = vmatmul.mubr.msk.f32.gmra.mxu1 %vm352_vm0, %v341_v6  ;;  %1006 = vmatprep.mubr.msk.f32.mxu0 %vm352_vm0, %v342_v8 }
  0x22   : > { %992 = vmatprep.mubr.msk.f32.mxu1 %vm352_vm0, %v342_v8 }
  0x24   : > { %1007 = vmatmul.mubr.msk.f32.gmra.mxu0 %vm352_vm0, %v343_v10 }
  0x25   : > { %993 = vmatmul.mubr.msk.f32.gmra.mxu1 %vm352_vm0, %v343_v10 }
  0xd0   : > { %v971_v12 = vpop.f32.mrf.mxu0 }
  0xd1   : > { %v977_v13 = vpop.f32.mrf.mxu1  ;;  %v449_v14 = vadd.f32 %v971_v12, %v896_v11 }
  0xd2   : > { %v469_v15 = vadd.f32 %v977_v13, %v896_v11  ;;  %v443_v16 = vpop.f32.mrf.mxu0 }
  0xd3   : > { %v463_v17 = vpop.f32.mrf.mxu1  ;;  %v933_v18 = vpack.c.bf16 %v449_v14, %v449_v14  ;;  %v444_v20 = vadd.f32 %v896_v11, %v443_v16 }
  0xd4   : > { %v937_v19 = vpack.c.bf16 %v469_v15, %v469_v15  ;;  %v464_v21 = vadd.f32 %v896_v11, %v463_v17  ;;  %v974_v22 = vpop.f32.mrf.mxu0 }
  0xd5   : > { %v980_v23 = vpop.f32.mrf.mxu1  ;;  %516 = vst.msk [vmem:[%s1129_s23 + $0x4] sm:$0xf] %vm514_vm1, %v933_v18  ;;  %v932_v24 = vpack.c.bf16 %v444_v20, %v444_v20  ;;  %v459_v26 = vadd.f32 %v974_v22, %v896_v11 }
  0xd6   : > { %520 = vst.msk [vmem:[%s1129_s23 + $0x14] sm:$0xf] %vm514_vm1, %v937_v19  ;;  %v936_v25 = vpack.c.bf16 %v464_v21, %v464_v21  ;;  %v479_v27 = vadd.f32 %v980_v23, %v896_v11  ;;  %v453_v28 = vpop.f32.mrf.mxu0 }
  0xd7   : > { %v473_v29 = vpop.f32.mrf.mxu1  ;;  %515 = vst.msk [vmem:[%s1129_s23] sm:$0xf] %vm514_vm1, %v932_v24  ;;  %v935_v31 = vpack.c.bf16 %v459_v26, %v459_v26  ;;  %v454_v33 = vadd.f32 %v896_v11, %v453_v28 }
  0xd8   : > { %519 = vst.msk [vmem:[%s1129_s23 + $0x10] sm:$0xf] %vm514_vm1, %v936_v25  ;;  %v939_v32 = vpack.c.bf16 %v479_v27, %v479_v27  ;;  %v474_v34 = vadd.f32 %v896_v11, %v473_v29  ;;  %v999_v36 = vpop.f32.mrf.mxu0 }
  0xd9   : > { %v985_v35 = vpop.f32.mrf.mxu1  ;;  %518 = vst.msk [vmem:[%s1129_s23 + $0xc] sm:$0xf] %vm514_vm1, %v935_v31  ;;  %v934_v37 = vpack.c.bf16 %v454_v33, %v454_v33 }
  0xda   : > { %522 = vst.msk [vmem:[%s1129_s23 + $0x1c] sm:$0xf] %vm514_vm1, %v939_v32  ;;  %v938_v38 = vpack.c.bf16 %v474_v34, %v474_v34  ;;  %v603_v39 = vadd.f32 %v985_v35, %v913_v30  ;;  %v712_v41 = vpop.f32.mrf.mxu0 }
  0xdb   : > { %752 = vst.msk [vmem:[%s1142_s29 + $0x8] sm:$0xff] %vm352_vm0, %v999_v36  ;;  %v597_v40 = vpop.f32.mrf.mxu1  ;;  %751 = vst.msk [vmem:[%s1142_s29] sm:$0xff] %vm352_vm0, %v712_v41 }
  0xdc   : > { %517 = vst.msk [vmem:[%s1129_s23 + $0x8] sm:$0xf] %vm514_vm1, %v934_v37  ;;  %521 = vst.msk [vmem:[%s1129_s23 + $0x18] sm:$0xf] %vm514_vm1, %v938_v38  ;;  %v598_v42 = vadd.f32 %v913_v30, %v597_v40  ;;  %v1002_v44 = vpop.f32.mrf.mxu0 }
  0xdd   : > { %638 = vst.msk [vmem:[%s1152_s10 + $0x8] sm:$0xff] %vm636_vm2, %v603_v39  ;;  %v988_v43 = vpop.f32.mrf.mxu1 }
  0xde   : > { %637 = vst.msk [vmem:[%s1152_s10] sm:$0xff] %vm636_vm2, %v598_v42  ;;  %v613_v45 = vadd.f32 %v988_v43, %v913_v30  ;;  %v722_v47 = vpop.f32.mrf.mxu0 }
  0xdf   : > { %754 = vst.msk [vmem:[%s1142_s29 + $0x18] sm:$0xff] %vm352_vm0, %v1002_v44  ;;  %v607_v46 = vpop.f32.mrf.mxu1  ;;  %753 = vst.msk [vmem:[%s1142_s29 + $0x10] sm:$0xff] %vm352_vm0, %v722_v47 }
  0xe0   : > { %640 = vst.msk [vmem:[%s1152_s10 + $0x18] sm:$0xff] %vm636_vm2, %v613_v45  ;;  %v608_v48 = vadd.f32 %v913_v30, %v607_v46  ;;  %v1005_v50 = vpop.f32.mrf.mxu0 }
  0xe1   : > { %v991_v49 = vpop.f32.mrf.mxu1  ;;  %756 = vst.msk [vmem:[%s1142_s29 + $0x28] sm:$0xff] %vm352_vm0, %v1005_v50 }
  0xe2   : > { %639 = vst.msk [vmem:[%s1152_s10 + $0x10] sm:$0xff] %vm636_vm2, %v608_v48  ;;  %v623_v51 = vadd.f32 %v991_v49, %v913_v30  ;;  %v732_v53 = vpop.f32.mrf.mxu0 }
  0xe3   : > { %v617_v52 = vpop.f32.mrf.mxu1  ;;  %755 = vst.msk [vmem:[%s1142_s29 + $0x20] sm:$0xff] %vm352_vm0, %v732_v53 }
  0xe4   : > { %642 = vst.msk [vmem:[%s1152_s10 + $0x28] sm:$0xff] %vm636_vm2, %v623_v51  ;;  %v618_v54 = vadd.f32 %v913_v30, %v617_v52  ;;  %v1008_v56 = vpop.f32.mrf.mxu0 }
  0xe5   : > { %v994_v55 = vpop.f32.mrf.mxu1  ;;  %758 = vst.msk [vmem:[%s1142_s29 + $0x38] sm:$0xff] %vm352_vm0, %v1008_v56 }
  0xe6   : > { %641 = vst.msk [vmem:[%s1152_s10 + $0x20] sm:$0xff] %vm636_vm2, %v618_v54  ;;  %v633_v57 = vadd.f32 %v994_v55, %v913_v30  ;;  %v742_v59 = vpop.f32.mrf.mxu0 }
  0xe7   : > { %v627_v58 = vpop.f32.mrf.mxu1  ;;  %757 = vst.msk [vmem:[%s1142_s29 + $0x30] sm:$0xff] %vm352_vm0, %v742_v59 }
  0xe8   : > { %644 = vst.msk [vmem:[%s1152_s10 + $0x38] sm:$0xff] %vm636_vm2, %v633_v57  ;;  %v628_v60 = vadd.f32 %v913_v30, %v627_v58 }
  0xea   : > { %643 = vst.msk [vmem:[%s1152_s10 + $0x30] sm:$0xff] %vm636_vm2, %v628_v60 }
  0xeb PF: > { %s19_s27 = sadd.s32 1, %s1025_s27  }
  0xec   : > { %p16_p4 = scmp.ge.s32.totalorder %s19_s27, 6  }
  0xee   :  { %18 = sbr.rel (!%p16_p4) target bundleno = 1 (0x1), region = 98 }

</bundles_post_ra>
